<compile_context>
chip_gen: v6e
topology: v6e:2x2x1
jax: 0.10.0
libtpu: 0.0.40
codegen_flags: <defaults>
</compile_context>

<pallas_src>
import numpy as np
import jax
import jax.numpy as jnp
from jax.experimental import pallas as pl
from jax.experimental.pallas import tpu as pltpu  # noqa: F401  (TPU backend parity)


# ----------------------------------------------------------------------------
# Cell-anchor generation (plain numpy, compile-time).  Mirrors
# generate_anchors / _generate_anchors of the PyTorch reference.
# ----------------------------------------------------------------------------
def _whctrs(anchor):
    w = anchor[2] - anchor[0] + 1
    h = anchor[3] - anchor[1] + 1
    x_ctr = anchor[0] + 0.5 * (w - 1)
    y_ctr = anchor[1] + 0.5 * (h - 1)
    return w, h, x_ctr, y_ctr


def _mkanchors(ws, hs, x_ctr, y_ctr):
    ws = ws[:, np.newaxis]
    hs = hs[:, np.newaxis]
    return np.hstack((x_ctr - 0.5 * (ws - 1), y_ctr - 0.5 * (hs - 1),
                      x_ctr + 0.5 * (ws - 1), y_ctr + 0.5 * (hs - 1)))


def _ratio_enum(anchor, ratios):
    w, h, x_ctr, y_ctr = _whctrs(anchor)
    size = w * h
    size_ratios = size / ratios
    ws = np.round(np.sqrt(size_ratios))
    hs = np.round(ws * ratios)
    return _mkanchors(ws, hs, x_ctr, y_ctr)


def _scale_enum(anchor, scales):
    w, h, x_ctr, y_ctr = _whctrs(anchor)
    ws = w * scales
    hs = h * scales
    return _mkanchors(ws, hs, x_ctr, y_ctr)


def generate_anchors_np(stride, sizes, aspect_ratios):
    scales = np.array(sizes, dtype=np.float64) / float(stride)
    ratios = np.array(aspect_ratios, dtype=np.float64)
    anchor = np.array([1, 1, stride, stride], dtype=np.float64) - 1
    anchors = _ratio_enum(anchor, ratios)
    anchors = np.vstack([_scale_enum(anchors[i, :], scales)
                         for i in range(anchors.shape[0])])
    return anchors.astype(np.float32)        # (A, 4)


def _round_up(x, m):
    return ((x + m - 1) // m) * m


# ----------------------------------------------------------------------------
# Fused Pallas kernel: one invocation computes shifted anchors (+ visibility)
# for every FPN level into lane-dense consolidated buffers.
# ----------------------------------------------------------------------------
def _make_fused_kernel(level_meta, a_max, has_vis, img_w, img_h, straddle):
    # level_meta: tuple of (A, HW, HW_pad, lane_offset) per level (static ints).
    neg_t = float(-straddle)
    w_lim = float(img_w + straddle)
    h_lim = float(img_h + straddle)

    def kernel(shifts_ref, bases_ref, anchors_ref, *vis_refs):
        for li, (A, _HW, HW_pad, off) in enumerate(level_meta):
            # Precomputed shifts for this level's lane slab (lane-aligned slices).
            s = shifts_ref[:, off:off + HW_pad]           # (2, HW_pad)
            sx = s[0:1]                                   # (1, HW_pad) shift_x
            sy = s[1:2]                                   # (1, HW_pad) shift_y

            # Tiny per-level base-anchor columns (no where-chains, no iota).
            b = bases_ref[li]                             # (4, A_max, 1)
            bx1, by1, bx2, by2 = b[0], b[1], b[2], b[3]   # (A_max, 1) each
            if A < a_max:
                bx1, by1, bx2, by2 = (c[:A] for c in (bx1, by1, bx2, by2))

            x1 = sx + bx1                                 # (A, HW_pad) broadcast adds
            y1 = sy + by1
            x2 = sx + bx2
            y2 = sy + by2

            # Stack along sublanes -> one wide, unmasked store per level.
            block = jnp.concatenate([x1, y1, x2, y2], axis=0)   # (4*A, HW_pad)
            anchors_ref[0:4 * A, off:off + HW_pad] = block

            if has_vis:
                v_ref = vis_refs[0]
                inside = ((x1 >= neg_t) & (y1 >= neg_t) &
                          (x2 < w_lim) & (y2 < h_lim))
                v_ref[0:A, off:off + HW_pad] = inside.astype(jnp.int32)

    return kernel


def _build_anchor_fn(level_params, img_w, img_h, straddle):
    """Returns a zero-arg callable producing ((bbox, vis), ...) per level."""
    # level_params: tuple of (stride, H, W, base_np[(A,4) float32]) per level.
    L = len(level_params)
    A_list = [base.shape[0] for (_, _, _, base) in level_params]
    A_max = max(A_list)
    has_vis = straddle >= 0

    level_meta = []
    off = 0
    for (_stride, H, W, base) in level_params:
        HW = H * W
        HW_pad = _round_up(HW, 128)          # 128-lane aligned slab per level
        level_meta.append((base.shape[0], HW, HW_pad, off))
        off += HW_pad
    HW_total = off

    # Host-side (numpy) operands: exact shifts for arbitrary grid widths and the
    # per-level base-anchor columns.
    shifts_np = np.zeros((2, HW_total), np.float32)
    bases_np = np.zeros((L, 4, A_max, 1), np.float32)
    for li, (stride, H, W, base) in enumerate(level_params):
        A, HW, _HW_pad, o = level_meta[li]
        xs = np.arange(W, dtype=np.float32) * float(stride)
        ys = np.arange(H, dtype=np.float32) * float(stride)
        shifts_np[0, o:o + HW] = np.tile(xs, H)       # shift_x, row-major flatten
        shifts_np[1, o:o + HW] = np.repeat(ys, W)     # shift_y
        bases_np[li, :, :A, 0] = base.T               # (4, A)

    kernel = _make_fused_kernel(tuple(level_meta), A_max, has_vis,
                                img_w, img_h, straddle)

    out_shape = [jax.ShapeDtypeStruct((4 * A_max, HW_total), jnp.float32)]
    if has_vis:
        out_shape.append(jax.ShapeDtypeStruct((A_max, HW_total), jnp.int32))

    call = pl.pallas_call(kernel, out_shape=tuple(out_shape))

    def fn(shifts, bases):
        outs = call(shifts, bases)
        a_all = outs[0]                       # (4*A_max, HW_total) coordinate-major
        v_all = outs[1] if has_vis else None  # (A_max, HW_total) int32
        per_level = []
        for (A, HW, _HW_pad, o) in level_meta:
            # Slice the valid lanes and reorder to the PyTorch convention
            # (location-major, anchor, coordinate) -> (H*W*A, 4).  These live
            # inside the same jitted executable as the kernel.
            # NOTE: consumers that can take the SoA (4, A, HW) layout directly
            # should use a_all and skip this AoS transpose.
            slab = a_all[0:4 * A, o:o + HW]
            bbox = jnp.transpose(slab.reshape(4, A, HW), (2, 1, 0)).reshape(-1, 4)
            if has_vis:
                vis = jnp.transpose(v_all[0:A, o:o + HW], (1, 0)).reshape(-1) != 0
            else:
                vis = jnp.ones((HW * A,), jnp.bool_)   # PyTorch: all visible
            per_level.append((bbox, vis))
        return tuple(per_level)

    fn_jit = jax.jit(fn)

    def run():
        return fn_jit(shifts_np, bases_np)

    return run


# ----------------------------------------------------------------------------
# AnchorGenerator equivalent
# ----------------------------------------------------------------------------
class AnchorGeneratorJAX:
    def __init__(self,
                 sizes=((20.0, 28.0), (40.0, 56.0), (80.0, 113.0), (160.0, 226.0)),
                 aspect_ratios=(0.5, 1.0, 2.0),
                 anchor_strides=(8, 16, 32, 64),
                 straddle_thresh=0):
        if len(anchor_strides) == 1:
            cell_anchors = [generate_anchors_np(anchor_strides[0], sizes,
                                                aspect_ratios)]
        else:
            if len(anchor_strides) != len(sizes):
                raise RuntimeError('FPN should have #anchor_strides == #sizes')
            cell_anchors = [
                generate_anchors_np(s, sz if isinstance(sz, (tuple, list)) else (sz,),
                                    aspect_ratios)
                for s, sz in zip(anchor_strides, sizes)]
        self.strides = anchor_strides
        self.cell_anchors = cell_anchors           # numpy float32 (A, 4) per level
        self.straddle_thresh = straddle_thresh
        self._cache = {}                           # anchors are data-independent

    def num_anchors_per_location(self):
        return [c.shape[0] for c in self.cell_anchors]

    def _per_level_anchors(self, grid_sizes, img_w, img_h):
        key = (tuple(grid_sizes), int(img_w), int(img_h), self.straddle_thresh)
        if key not in self._cache:
            level_params = tuple(
                (int(stride), int(gh), int(gw), base)
                for (gh, gw), stride, base in zip(grid_sizes, self.strides,
                                                  self.cell_anchors))
            run = _build_anchor_fn(level_params, int(img_w), int(img_h),
                                   self.straddle_thresh)
            self._cache[key] = run()               # single fused device launch
        return self._cache[key]

    def forward(self, image_list, feature_maps, image_sizes=None):
        grid_sizes = [tuple(fm.shape[-2:]) for fm in feature_maps]
        if image_sizes is None:
            # TODO(synk): PyTorch uses per-image ImageList.image_sizes; when not
            # provided, every image falls back to the padded batch shape for the
            # visibility test (differs for batches with mixed image sizes).
            h, w = int(image_list.shape[-2]), int(image_list.shape[-1])
            image_sizes = [(w, h)] * int(image_list.shape[0])

        anchors = []
        for (img_w, img_h) in image_sizes:
            per_level = self._per_level_anchors(grid_sizes, img_w, img_h)
            anchors_in_image = []
            for bbox, vis in per_level:
                anchors_in_image.append({
                    "bbox": bbox,                  # (H*W*A, 4) float32, xyxy
                    "size": (img_w, img_h),
                    "mode": "xyxy",
                    "visibility": vis,             # (H*W*A,) bool
                })
            anchors.append(anchors_in_image)
        return anchors


# ----------------------------------------------------------------------------
# numpy reference (correctness check vs. the PyTorch semantics)
# ----------------------------------------------------------------------------
def _ref_level(base, gh, gw, stride, img_w, img_h, t):
    sx = np.arange(0, gw * stride, stride, dtype=np.float32)
    sy = np.arange(0, gh * stride, stride, dtype=np.float32)
    shift_y, shift_x = np.meshgrid(sy, sx, indexing='ij')
    shift_x = shift_x.reshape(-1)
    shift_y = shift_y.reshape(-1)
    shifts = np.stack((shift_x, shift_y, shift_x, shift_y), axis=1)
    a = (shifts[:, None, :] + base[None, :, :]).reshape(-1, 4)
    if t >= 0:
        vis = ((a[:, 0] >= -t) & (a[:, 1] >= -t) &
               (a[:, 2] < img_w + t) & (a[:, 3] < img_h + t))
    else:
        vis = np.ones(a.shape[0], dtype=bool)
    return a.astype(np.float32), vis


if __name__ == "__main__":
    key = jax.random.PRNGKey(0)
    k_img, *k_feat = jax.random.split(key, 5)

    B, C_img, H_img, W_img = 2, 3, 128, 128
    strides = (8, 16, 32, 64)
    image_list = jax.random.normal(k_img, (B, C_img, H_img, W_img), jnp.float32)
    feature_maps = [
        jax.random.normal(k, (B, 4, H_img // s, W_img // s), jnp.float32)
        for k, s in zip(k_feat, strides)
    ]

    gen = AnchorGeneratorJAX()
    anchors = gen.forward(image_list, feature_maps)

    # Block on results.
    for img_anchors in anchors:
        for lvl in img_anchors:
            jax.block_until_ready(lvl["bbox"])
            jax.block_until_ready(lvl["visibility"])

    # Verify against the numpy reference of the PyTorch semantics.
    ok = True
    for lvl_idx, fm in enumerate(feature_maps):
        gh, gw = fm.shape[-2:]
        ref_bbox, ref_vis = _ref_level(np.asarray(gen.cell_anchors[lvl_idx]),
                                       gh, gw, strides[lvl_idx],
                                       W_img, H_img, gen.straddle_thresh)
        got = anchors[0][lvl_idx]
        ok &= np.allclose(np.asarray(got["bbox"]), ref_bbox, atol=1e-5)
        ok &= np.array_equal(np.asarray(got["visibility"]), ref_vis)
    assert ok, "Pallas anchor kernel mismatch vs. reference"

    print("KERNEL_OK")
</pallas_src>

<mosaic_0001>
module attributes {stable_mosaic.version = 11 : i64} {
  func.func @kernel(%arg0: memref<2x640xf32, #tpu.memory_space<vmem>>, %arg1: memref<4x4x6x1xf32, #tpu.memory_space<vmem>>, %arg2: memref<24x640xf32, #tpu.memory_space<vmem>>, %arg3: memref<6x640xi32, #tpu.memory_space<vmem>>) attributes {dimension_semantics = [], scalar_prefetch = 0 : i64, scratch_operands = 0 : i64, tpu.core_type = #tpu.core_type<tc>} {
    %c0 = arith.constant 0 : index
    %c0_0 = arith.constant 0 : index
    %0 = vector.load %arg0[%c0, %c0_0] : memref<2x640xf32, #tpu.memory_space<vmem>>, vector<2x256xf32>
    %1 = vector.extract_strided_slice %0 {offsets = [0, 0], sizes = [1, 256], strides = [1, 1]} : vector<2x256xf32> to vector<1x256xf32>
    %2 = vector.extract_strided_slice %0 {offsets = [1, 0], sizes = [1, 256], strides = [1, 1]} : vector<2x256xf32> to vector<1x256xf32>
    %c0_1 = arith.constant 0 : index
    %c0_2 = arith.constant 0 : index
    %c0_3 = arith.constant 0 : index
    %c0_4 = arith.constant 0 : index
    %3 = vector.load %arg1[%c0_1, %c0_2, %c0_3, %c0_4] : memref<4x4x6x1xf32, #tpu.memory_space<vmem>>, vector<1x4x6x1xf32>
    %4 = vector.shape_cast %3 : vector<1x4x6x1xf32> to vector<4x6x1xf32>
    %5 = vector.extract_strided_slice %4 {offsets = [0, 0, 0], sizes = [1, 6, 1], strides = [1, 1, 1]} : vector<4x6x1xf32> to vector<1x6x1xf32>
    %6 = vector.shape_cast %5 : vector<1x6x1xf32> to vector<6x1xf32>
    %7 = vector.extract_strided_slice %4 {offsets = [1, 0, 0], sizes = [1, 6, 1], strides = [1, 1, 1]} : vector<4x6x1xf32> to vector<1x6x1xf32>
    %8 = vector.shape_cast %7 : vector<1x6x1xf32> to vector<6x1xf32>
    %9 = vector.extract_strided_slice %4 {offsets = [2, 0, 0], sizes = [1, 6, 1], strides = [1, 1, 1]} : vector<4x6x1xf32> to vector<1x6x1xf32>
    %10 = vector.shape_cast %9 : vector<1x6x1xf32> to vector<6x1xf32>
    %11 = vector.extract_strided_slice %4 {offsets = [3, 0, 0], sizes = [1, 6, 1], strides = [1, 1, 1]} : vector<4x6x1xf32> to vector<1x6x1xf32>
    %12 = vector.shape_cast %11 : vector<1x6x1xf32> to vector<6x1xf32>
    %13 = vector.broadcast %1 : vector<1x256xf32> to vector<6x256xf32>
    %14 = vector.broadcast %6 : vector<6x1xf32> to vector<6x256xf32>
    %15 = arith.addf %13, %14 : vector<6x256xf32>
    %16 = vector.broadcast %2 : vector<1x256xf32> to vector<6x256xf32>
    %17 = vector.broadcast %8 : vector<6x1xf32> to vector<6x256xf32>
    %18 = arith.addf %16, %17 : vector<6x256xf32>
    %19 = vector.broadcast %1 : vector<1x256xf32> to vector<6x256xf32>
    %20 = vector.broadcast %10 : vector<6x1xf32> to vector<6x256xf32>
    %21 = arith.addf %19, %20 : vector<6x256xf32>
    %22 = vector.broadcast %2 : vector<1x256xf32> to vector<6x256xf32>
    %23 = vector.broadcast %12 : vector<6x1xf32> to vector<6x256xf32>
    %24 = arith.addf %22, %23 : vector<6x256xf32>
    %25 = tpu.concatenate %15, %18, %21, %24 in 0 : vector<6x256xf32>, vector<6x256xf32>, vector<6x256xf32>, vector<6x256xf32> -> vector<24x256xf32>
    %c0_5 = arith.constant 0 : index
    %c0_6 = arith.constant 0 : index
    %26 = vector.load %arg2[%c0_5, %c0_6] : memref<24x640xf32, #tpu.memory_space<vmem>>, vector<24x256xf32>
    tpu.vector_store %arg2[%c0_5, %c0_6], %25 {strides = array<i32>} : memref<24x640xf32, #tpu.memory_space<vmem>>, vector<24x256xf32>,
    %cst = arith.constant 0.000000e+00 : f32
    %27 = vector.broadcast %cst : f32 to vector<6x256xf32>
    %28 = arith.cmpf oge, %15, %27 : vector<6x256xf32>
    %cst_7 = arith.constant 0.000000e+00 : f32
    %29 = vector.broadcast %cst_7 : f32 to vector<6x256xf32>
    %30 = arith.cmpf oge, %18, %29 : vector<6x256xf32>
    %31 = arith.andi %28, %30 : vector<6x256xi1>
    %cst_8 = arith.constant 1.280000e+02 : f32
    %32 = vector.broadcast %cst_8 : f32 to vector<6x256xf32>
    %33 = arith.cmpf olt, %21, %32 : vector<6x256xf32>
    %34 = arith.andi %31, %33 : vector<6x256xi1>
    %cst_9 = arith.constant 1.280000e+02 : f32
    %35 = vector.broadcast %cst_9 : f32 to vector<6x256xf32>
    %36 = arith.cmpf olt, %24, %35 : vector<6x256xf32>
    %37 = arith.andi %34, %36 : vector<6x256xi1>
    %38 = arith.extui %37 : vector<6x256xi1> to vector<6x256xi32>
    %c0_10 = arith.constant 0 : index
    %c0_11 = arith.constant 0 : index
    %39 = vector.load %arg3[%c0_10, %c0_11] : memref<6x640xi32, #tpu.memory_space<vmem>>, vector<6x256xi32>
    tpu.vector_store %arg3[%c0_10, %c0_11], %38 {strides = array<i32>} : memref<6x640xi32, #tpu.memory_space<vmem>>, vector<6x256xi32>,
    %c0_12 = arith.constant 0 : index
    %c256 = arith.constant 256 : index
    %40 = vector.load %arg0[%c0_12, %c256] : memref<2x640xf32, #tpu.memory_space<vmem>>, vector<2x128xf32>
    %41 = vector.extract_strided_slice %40 {offsets = [0, 0], sizes = [1, 128], strides = [1, 1]} : vector<2x128xf32> to vector<1x128xf32>
    %42 = vector.extract_strided_slice %40 {offsets = [1, 0], sizes = [1, 128], strides = [1, 1]} : vector<2x128xf32> to vector<1x128xf32>
    %c1 = arith.constant 1 : index
    %c0_13 = arith.constant 0 : index
    %c0_14 = arith.constant 0 : index
    %c0_15 = arith.constant 0 : index
    %43 = vector.load %arg1[%c1, %c0_13, %c0_14, %c0_15] : memref<4x4x6x1xf32, #tpu.memory_space<vmem>>, vector<1x4x6x1xf32>
    %44 = vector.shape_cast %43 : vector<1x4x6x1xf32> to vector<4x6x1xf32>
    %45 = vector.extract_strided_slice %44 {offsets = [0, 0, 0], sizes = [1, 6, 1], strides = [1, 1, 1]} : vector<4x6x1xf32> to vector<1x6x1xf32>
    %46 = vector.shape_cast %45 : vector<1x6x1xf32> to vector<6x1xf32>
    %47 = vector.extract_strided_slice %44 {offsets = [1, 0, 0], sizes = [1, 6, 1], strides = [1, 1, 1]} : vector<4x6x1xf32> to vector<1x6x1xf32>
    %48 = vector.shape_cast %47 : vector<1x6x1xf32> to vector<6x1xf32>
    %49 = vector.extract_strided_slice %44 {offsets = [2, 0, 0], sizes = [1, 6, 1], strides = [1, 1, 1]} : vector<4x6x1xf32> to vector<1x6x1xf32>
    %50 = vector.shape_cast %49 : vector<1x6x1xf32> to vector<6x1xf32>
    %51 = vector.extract_strided_slice %44 {offsets = [3, 0, 0], sizes = [1, 6, 1], strides = [1, 1, 1]} : vector<4x6x1xf32> to vector<1x6x1xf32>
    %52 = vector.shape_cast %51 : vector<1x6x1xf32> to vector<6x1xf32>
    %53 = vector.broadcast %41 : vector<1x128xf32> to vector<6x128xf32>
    %54 = vector.broadcast %46 : vector<6x1xf32> to vector<6x128xf32>
    %55 = arith.addf %53, %54 : vector<6x128xf32>
    %56 = vector.broadcast %42 : vector<1x128xf32> to vector<6x128xf32>
    %57 = vector.broadcast %48 : vector<6x1xf32> to vector<6x128xf32>
    %58 = arith.addf %56, %57 : vector<6x128xf32>
    %59 = vector.broadcast %41 : vector<1x128xf32> to vector<6x128xf32>
    %60 = vector.broadcast %50 : vector<6x1xf32> to vector<6x128xf32>
    %61 = arith.addf %59, %60 : vector<6x128xf32>
    %62 = vector.broadcast %42 : vector<1x128xf32> to vector<6x128xf32>
    %63 = vector.broadcast %52 : vector<6x1xf32> to vector<6x128xf32>
    %64 = arith.addf %62, %63 : vector<6x128xf32>
    %65 = tpu.concatenate %55, %58, %61, %64 in 0 : vector<6x128xf32>, vector<6x128xf32>, vector<6x128xf32>, vector<6x128xf32> -> vector<24x128xf32>
    %c0_16 = arith.constant 0 : index
    %c256_17 = arith.constant 256 : index
    %66 = vector.load %arg2[%c0_16, %c256_17] : memref<24x640xf32, #tpu.memory_space<vmem>>, vector<24x128xf32>
    tpu.vector_store %arg2[%c0_16, %c256_17], %65 {strides = array<i32>} : memref<24x640xf32, #tpu.memory_space<vmem>>, vector<24x128xf32>,
    %cst_18 = arith.constant 0.000000e+00 : f32
    %67 = vector.broadcast %cst_18 : f32 to vector<6x128xf32>
    %68 = arith.cmpf oge, %55, %67 : vector<6x128xf32>
    %cst_19 = arith.constant 0.000000e+00 : f32
    %69 = vector.broadcast %cst_19 : f32 to vector<6x128xf32>
    %70 = arith.cmpf oge, %58, %69 : vector<6x128xf32>
    %71 = arith.andi %68, %70 : vector<6x128xi1>
    %cst_20 = arith.constant 1.280000e+02 : f32
    %72 = vector.broadcast %cst_20 : f32 to vector<6x128xf32>
    %73 = arith.cmpf olt, %61, %72 : vector<6x128xf32>
    %74 = arith.andi %71, %73 : vector<6x128xi1>
    %cst_21 = arith.constant 1.280000e+02 : f32
    %75 = vector.broadcast %cst_21 : f32 to vector<6x128xf32>
    %76 = arith.cmpf olt, %64, %75 : vector<6x128xf32>
    %77 = arith.andi %74, %76 : vector<6x128xi1>
    %78 = arith.extui %77 : vector<6x128xi1> to vector<6x128xi32>
    %c0_22 = arith.constant 0 : index
    %c256_23 = arith.constant 256 : index
    %79 = vector.load %arg3[%c0_22, %c256_23] : memref<6x640xi32, #tpu.memory_space<vmem>>, vector<6x128xi32>
    tpu.vector_store %arg3[%c0_22, %c256_23], %78 {strides = array<i32>} : memref<6x640xi32, #tpu.memory_space<vmem>>, vector<6x128xi32>,
    %c0_24 = arith.constant 0 : index
    %c384 = arith.constant 384 : index
    %80 = vector.load %arg0[%c0_24, %c384] : memref<2x640xf32, #tpu.memory_space<vmem>>, vector<2x128xf32>
    %81 = vector.extract_strided_slice %80 {offsets = [0, 0], sizes = [1, 128], strides = [1, 1]} : vector<2x128xf32> to vector<1x128xf32>
    %82 = vector.extract_strided_slice %80 {offsets = [1, 0], sizes = [1, 128], strides = [1, 1]} : vector<2x128xf32> to vector<1x128xf32>
    %c2 = arith.constant 2 : index
    %c0_25 = arith.constant 0 : index
    %c0_26 = arith.constant 0 : index
    %c0_27 = arith.constant 0 : index
    %83 = vector.load %arg1[%c2, %c0_25, %c0_26, %c0_27] : memref<4x4x6x1xf32, #tpu.memory_space<vmem>>, vector<1x4x6x1xf32>
    %84 = vector.shape_cast %83 : vector<1x4x6x1xf32> to vector<4x6x1xf32>
    %85 = vector.extract_strided_slice %84 {offsets = [0, 0, 0], sizes = [1, 6, 1], strides = [1, 1, 1]} : vector<4x6x1xf32> to vector<1x6x1xf32>
    %86 = vector.shape_cast %85 : vector<1x6x1xf32> to vector<6x1xf32>
    %87 = vector.extract_strided_slice %84 {offsets = [1, 0, 0], sizes = [1, 6, 1], strides = [1, 1, 1]} : vector<4x6x1xf32> to vector<1x6x1xf32>
    %88 = vector.shape_cast %87 : vector<1x6x1xf32> to vector<6x1xf32>
    %89 = vector.extract_strided_slice %84 {offsets = [2, 0, 0], sizes = [1, 6, 1], strides = [1, 1, 1]} : vector<4x6x1xf32> to vector<1x6x1xf32>
    %90 = vector.shape_cast %89 : vector<1x6x1xf32> to vector<6x1xf32>
    %91 = vector.extract_strided_slice %84 {offsets = [3, 0, 0], sizes = [1, 6, 1], strides = [1, 1, 1]} : vector<4x6x1xf32> to vector<1x6x1xf32>
    %92 = vector.shape_cast %91 : vector<1x6x1xf32> to vector<6x1xf32>
    %93 = vector.broadcast %81 : vector<1x128xf32> to vector<6x128xf32>
    %94 = vector.broadcast %86 : vector<6x1xf32> to vector<6x128xf32>
    %95 = arith.addf %93, %94 : vector<6x128xf32>
    %96 = vector.broadcast %82 : vector<1x128xf32> to vector<6x128xf32>
    %97 = vector.broadcast %88 : vector<6x1xf32> to vector<6x128xf32>
    %98 = arith.addf %96, %97 : vector<6x128xf32>
    %99 = vector.broadcast %81 : vector<1x128xf32> to vector<6x128xf32>
    %100 = vector.broadcast %90 : vector<6x1xf32> to vector<6x128xf32>
    %101 = arith.addf %99, %100 : vector<6x128xf32>
    %102 = vector.broadcast %82 : vector<1x128xf32> to vector<6x128xf32>
    %103 = vector.broadcast %92 : vector<6x1xf32> to vector<6x128xf32>
    %104 = arith.addf %102, %103 : vector<6x128xf32>
    %105 = tpu.concatenate %95, %98, %101, %104 in 0 : vector<6x128xf32>, vector<6x128xf32>, vector<6x128xf32>, vector<6x128xf32> -> vector<24x128xf32>
    %c0_28 = arith.constant 0 : index
    %c384_29 = arith.constant 384 : index
    %106 = vector.load %arg2[%c0_28, %c384_29] : memref<24x640xf32, #tpu.memory_space<vmem>>, vector<24x128xf32>
    tpu.vector_store %arg2[%c0_28, %c384_29], %105 {strides = array<i32>} : memref<24x640xf32, #tpu.memory_space<vmem>>, vector<24x128xf32>,
    %cst_30 = arith.constant 0.000000e+00 : f32
    %107 = vector.broadcast %cst_30 : f32 to vector<6x128xf32>
    %108 = arith.cmpf oge, %95, %107 : vector<6x128xf32>
    %cst_31 = arith.constant 0.000000e+00 : f32
    %109 = vector.broadcast %cst_31 : f32 to vector<6x128xf32>
    %110 = arith.cmpf oge, %98, %109 : vector<6x128xf32>
    %111 = arith.andi %108, %110 : vector<6x128xi1>
    %cst_32 = arith.constant 1.280000e+02 : f32
    %112 = vector.broadcast %cst_32 : f32 to vector<6x128xf32>
    %113 = arith.cmpf olt, %101, %112 : vector<6x128xf32>
    %114 = arith.andi %111, %113 : vector<6x128xi1>
    %cst_33 = arith.constant 1.280000e+02 : f32
    %115 = vector.broadcast %cst_33 : f32 to vector<6x128xf32>
    %116 = arith.cmpf olt, %104, %115 : vector<6x128xf32>
    %117 = arith.andi %114, %116 : vector<6x128xi1>
    %118 = arith.extui %117 : vector<6x128xi1> to vector<6x128xi32>
    %c0_34 = arith.constant 0 : index
    %c384_35 = arith.constant 384 : index
    %119 = vector.load %arg3[%c0_34, %c384_35] : memref<6x640xi32, #tpu.memory_space<vmem>>, vector<6x128xi32>
    tpu.vector_store %arg3[%c0_34, %c384_35], %118 {strides = array<i32>} : memref<6x640xi32, #tpu.memory_space<vmem>>, vector<6x128xi32>,
    %c0_36 = arith.constant 0 : index
    %c512 = arith.constant 512 : index
    %120 = vector.load %arg0[%c0_36, %c512] : memref<2x640xf32, #tpu.memory_space<vmem>>, vector<2x128xf32>
    %121 = vector.extract_strided_slice %120 {offsets = [0, 0], sizes = [1, 128], strides = [1, 1]} : vector<2x128xf32> to vector<1x128xf32>
    %122 = vector.extract_strided_slice %120 {offsets = [1, 0], sizes = [1, 128], strides = [1, 1]} : vector<2x128xf32> to vector<1x128xf32>
    %c3 = arith.constant 3 : index
    %c0_37 = arith.constant 0 : index
    %c0_38 = arith.constant 0 : index
    %c0_39 = arith.constant 0 : index
    %123 = vector.load %arg1[%c3, %c0_37, %c0_38, %c0_39] : memref<4x4x6x1xf32, #tpu.memory_space<vmem>>, vector<1x4x6x1xf32>
    %124 = vector.shape_cast %123 : vector<1x4x6x1xf32> to vector<4x6x1xf32>
    %125 = vector.extract_strided_slice %124 {offsets = [0, 0, 0], sizes = [1, 6, 1], strides = [1, 1, 1]} : vector<4x6x1xf32> to vector<1x6x1xf32>
    %126 = vector.shape_cast %125 : vector<1x6x1xf32> to vector<6x1xf32>
    %127 = vector.extract_strided_slice %124 {offsets = [1, 0, 0], sizes = [1, 6, 1], strides = [1, 1, 1]} : vector<4x6x1xf32> to vector<1x6x1xf32>
    %128 = vector.shape_cast %127 : vector<1x6x1xf32> to vector<6x1xf32>
    %129 = vector.extract_strided_slice %124 {offsets = [2, 0, 0], sizes = [1, 6, 1], strides = [1, 1, 1]} : vector<4x6x1xf32> to vector<1x6x1xf32>
    %130 = vector.shape_cast %129 : vector<1x6x1xf32> to vector<6x1xf32>
    %131 = vector.extract_strided_slice %124 {offsets = [3, 0, 0], sizes = [1, 6, 1], strides = [1, 1, 1]} : vector<4x6x1xf32> to vector<1x6x1xf32>
    %132 = vector.shape_cast %131 : vector<1x6x1xf32> to vector<6x1xf32>
    %133 = vector.broadcast %121 : vector<1x128xf32> to vector<6x128xf32>
    %134 = vector.broadcast %126 : vector<6x1xf32> to vector<6x128xf32>
    %135 = arith.addf %133, %134 : vector<6x128xf32>
    %136 = vector.broadcast %122 : vector<1x128xf32> to vector<6x128xf32>
    %137 = vector.broadcast %128 : vector<6x1xf32> to vector<6x128xf32>
    %138 = arith.addf %136, %137 : vector<6x128xf32>
    %139 = vector.broadcast %121 : vector<1x128xf32> to vector<6x128xf32>
    %140 = vector.broadcast %130 : vector<6x1xf32> to vector<6x128xf32>
    %141 = arith.addf %139, %140 : vector<6x128xf32>
    %142 = vector.broadcast %122 : vector<1x128xf32> to vector<6x128xf32>
    %143 = vector.broadcast %132 : vector<6x1xf32> to vector<6x128xf32>
    %144 = arith.addf %142, %143 : vector<6x128xf32>
    %145 = tpu.concatenate %135, %138, %141, %144 in 0 : vector<6x128xf32>, vector<6x128xf32>, vector<6x128xf32>, vector<6x128xf32> -> vector<24x128xf32>
    %c0_40 = arith.constant 0 : index
    %c512_41 = arith.constant 512 : index
    %146 = vector.load %arg2[%c0_40, %c512_41] : memref<24x640xf32, #tpu.memory_space<vmem>>, vector<24x128xf32>
    tpu.vector_store %arg2[%c0_40, %c512_41], %145 {strides = array<i32>} : memref<24x640xf32, #tpu.memory_space<vmem>>, vector<24x128xf32>,
    %cst_42 = arith.constant 0.000000e+00 : f32
    %147 = vector.broadcast %cst_42 : f32 to vector<6x128xf32>
    %148 = arith.cmpf oge, %135, %147 : vector<6x128xf32>
    %cst_43 = arith.constant 0.000000e+00 : f32
    %149 = vector.broadcast %cst_43 : f32 to vector<6x128xf32>
    %150 = arith.cmpf oge, %138, %149 : vector<6x128xf32>
    %151 = arith.andi %148, %150 : vector<6x128xi1>
    %cst_44 = arith.constant 1.280000e+02 : f32
    %152 = vector.broadcast %cst_44 : f32 to vector<6x128xf32>
    %153 = arith.cmpf olt, %141, %152 : vector<6x128xf32>
    %154 = arith.andi %151, %153 : vector<6x128xi1>
    %cst_45 = arith.constant 1.280000e+02 : f32
    %155 = vector.broadcast %cst_45 : f32 to vector<6x128xf32>
    %156 = arith.cmpf olt, %144, %155 : vector<6x128xf32>
    %157 = arith.andi %154, %156 : vector<6x128xi1>
    %158 = arith.extui %157 : vector<6x128xi1> to vector<6x128xi32>
    %c0_46 = arith.constant 0 : index
    %c512_47 = arith.constant 512 : index
    %159 = vector.load %arg3[%c0_46, %c512_47] : memref<6x640xi32, #tpu.memory_space<vmem>>, vector<6x128xi32>
    tpu.vector_store %arg3[%c0_46, %c512_47], %158 {strides = array<i32>} : memref<6x640xi32, #tpu.memory_space<vmem>>, vector<6x128xi32>,
    return
  }
}

</mosaic_0001>

<bundles_post_ra>
// kernel: fn.1
= control target key start
LH: loop header
LB: loop body
LE: loop exit
PB: predicated region body
PF: predicated region fallthrough
CT: control target
= control target key end

     0   :  { %v343_v0 = vmov 0   ;;  %v19_v17 = vlaneseq  ;;  %vm101_vm0 = vcmask 1045504   ;;  %vm104_vm2 = vcmask 1043456   ;;  %s606_s1 = inlined_call_operand.vmem [shape: f32[4,4,6,1], index: 1, kind: input, shape index: {}]   ;;  %s607_s0 = inlined_call_operand.vmem [shape: f32[2,640], index: 0, kind: input, shape index: {}]   ;;  %s608_s2 = inlined_call_operand.vmem [shape: f32[24,640], index: 2, kind: output, shape index: {0}]   ;;  %s609_s3 = inlined_call_operand.vmem [shape: s32[6,640], index: 3, kind: output, shape index: {1}]  }
   0x1   :  { %342 = vset.pattern.permute.xlu1 %v343_v0  ;;  %341 = vset.pattern.permute.xlu0 %v343_v0  ;;  %v328_v1 = vld [vmem:[%s606_s1 + $0x20] sm:$0x3f]  ;;  %v329_v3 = vld [vmem:[%s606_s1 + $0x28] sm:$0x3f]  ;;  %v330_v9 = vld [vmem:[%s606_s1 + $0x30] sm:$0x3f] }
   0x2   :  { %v14_v2 = vld [vmem:[%s606_s1] sm:$0x3f]  ;;  %146 = vperm.xlu1 %342, %v328_v1   ;;  %v15_v4 = vld [vmem:[%s606_s1 + $0x8] sm:$0x3f]  ;;  %v16_v10 = vld [vmem:[%s606_s1 + $0x10] sm:$0x3f] }
   0x3   :  { %39 = vperm.xlu0 %341, %v14_v2   ;;  %v333_v5 = vld [vmem:[%s606_s1 + $0x48] sm:$0x3f]  ;;  %v332_v6 = vld [vmem:[%s606_s1 + $0x40] sm:$0x3f]  ;;  %v338_v11 = vld [vmem:[%s606_s1 + $0x70] sm:$0x3f] }
   0x4   :  { %v337_v7 = vld [vmem:[%s606_s1 + $0x68] sm:$0x3f]  ;;  %v336_v8 = vld [vmem:[%s606_s1 + $0x60] sm:$0x3f]  ;;  %v334_v12 = vld [vmem:[%s606_s1 + $0x50] sm:$0x3f] }
   0x5   :  { %v331_v13 = vld [vmem:[%s606_s1 + $0x38] sm:$0x3f]  ;;  %v20_v18 = vshrl.u32 %v19_v17, 7  ;;  %v13_v23 = vld [vmem:[%s607_s0] sm:$0xf] }
   0x6   :  { %156 = vperm.xlu1 %342, %v329_v3   ;;  %v17_v14 = vld [vmem:[%s606_s1 + $0x18] sm:$0x3f]  ;;  %v134_v27 = vld [vmem:[%s607_s0 + $0x4] sm:$0x3]  ;;  %v196_v36 = vld [vmem:[%s607_s0 + $0x6] sm:$0x3] }
   0x7   :  { %64 = vperm.xlu0 %341, %v15_v4   ;;  %v339_v15 = vld [vmem:[%s606_s1 + $0x78] sm:$0x3f]  ;;  %v46_v19 = vsub.s32 1, %v20_v18  ;;  %v50_v20 = vsub.s32 3, %v20_v18  ;;  %v21_v21 = vsub.s32 0, %v20_v18  ;;  %v25_v22 = vsub.s32 2, %v20_v18 }
   0x8   :  { %v335_v16 = vld [vmem:[%s606_s1 + $0x58] sm:$0x3f]  ;;  %v258_v44 = vld [vmem:[%s607_s0 + $0x8] sm:$0x3] }
   0x9   :  { %v47_v24 = vrot.slane %v13_v23, %v46_v19  ;;  %v51_v25 = vrot.slane %v13_v23, %v50_v20  ;;  %v22_v26 = vrot.slane %v13_v23, %v21_v21  ;;  %v26_v28 = vrot.slane %v13_v23, %v25_v22 }
   0xa   :  { %218 = vperm.xlu1 %342, %v333_v5   ;;  %v420_v31 = vrot.slane %v134_v27, %v46_v19  ;;  %v143_v34 = vrot.slane %v134_v27, %v21_v21  ;;  %v432_v43 = vrot.slane %v196_v36, %v46_v19  ;;  %v205_v47 = vrot.slane %v196_v36, %v21_v21 }
   0xb   :  { %208 = vperm.xlu0 %341, %v332_v6   ;;  %v422_v32 = vrot.slane %v47_v24, %v46_v19  ;;  %v424_v33 = vrot.slane %v51_v25, %v46_v19  ;;  %v32_v35 = vrot.slane %v22_v26, %v21_v21  ;;  %v36_v37 = vrot.slane %v26_v28, %v21_v21 }
   0xc   :  { %v437_v54 = vrot.slane %v258_v44, %v46_v19  ;;  %v267_v61 = vrot.slane %v258_v44, %v21_v21 }
   0xe   :  { %280 = vperm.xlu1 %342, %v337_v7  }
   0xf   :  { %270 = vperm.xlu0 %341, %v336_v8  }
  0x12   :  { %162 = vperm.xlu1 %342, %v330_v9  }
  0x13   :  { %71 = vperm.xlu0 %341, %v16_v10  }
  0x16   :  { %286 = vperm.xlu1 %342, %v338_v11  }
  0x17   :  { %224 = vperm.xlu0 %341, %v334_v12  }
  0x1a   :  { %168 = vperm.xlu1 %342, %v331_v13  }
  0x1b   :  { %78 = vperm.xlu0 %341, %v17_v14  }
  0x1e   :  { %292 = vperm.xlu1 %342, %v339_v15  }
  0x1f   :  { %230 = vperm.xlu0 %341, %v335_v16  }
  0x7d   :  { %v147_v29 = vpop.permute.xlu1 %146 }
  0x7e   :  { %v40_v30 = vpop.permute.xlu0 %39  ;;  %v149_v45 = vadd.f32 %v147_v29, %v143_v34 }
  0x7f   :  { %v42_v46 = vadd.f32 %v40_v30, %v32_v35  ;;  %v43_v48 = vadd.f32 %v40_v30, %v36_v37 }
  0x80   :  { %vm187_vm3 = vcmp.ge.f32.partialorder %v149_v45, 0.0 }
  0x81   :  { %v157_v38 = vpop.permute.xlu1 %156  ;;  %vm116_vm4 = vcmp.ge.f32.partialorder %v42_v46, 0.0  ;;  %vm117_vm5 = vcmp.ge.f32.partialorder %v43_v48, 0.0 }
  0x82   :  { %v65_v39 = vpop.permute.xlu0 %64  ;;  %v159_v40 = vadd.f32 %v157_v38, %v420_v31 }
  0x83   :  { %v67_v41 = vadd.f32 %v65_v39, %v422_v32  ;;  %v68_v42 = vadd.f32 %v65_v39, %v424_v33 }
  0x84   :  { %v173_v49 = vrot.slane %v159_v40, 2  ;;  %vm188_vm1 = vcmp.ge.f32.partialorder %v159_v40, 0.0 }
  0x85   :  { %v85_v50 = vrot.slane %v67_v41, 2  ;;  %v86_v51 = vrot.slane %v68_v42, 2  ;;  %v219_v52 = vpop.permute.xlu1 %218  ;;  %vm118_vm6 = vcmp.ge.f32.partialorder %v67_v41, 0.0  ;;  %vm119_vm7 = vcmp.ge.f32.partialorder %v68_v42, 0.0  ;;  %vm474_vm8 = vmand %vm187_vm3, %vm188_vm1 }
  0x86   :  { %v209_v53 = vpop.permute.xlu0 %208  ;;  %v181_v55 = vsel %vm101_vm0, %v149_v45, %v173_v49  ;;  %v443_v58 = vadd.f32 %v219_v52, %v432_v43  ;;  %vm480_vm13 = vmand %vm116_vm4, %vm118_vm6 }
  0x87   :  { %v102_v56 = vsel %vm101_vm0, %v42_v46, %v85_v50  ;;  %v103_v57 = vsel %vm101_vm0, %v43_v48, %v86_v51  ;;  %184 = vst [vmem:[%s608_s2 + $0x10] sm:$0xff] %v181_v55  ;;  %v211_v60 = vadd.f32 %v209_v53, %v205_v47  ;;  %vm491_vm14 = vmand %vm117_vm5, %vm119_vm7  ;;  %vm107_vm7 = vcmask 1041408  }
  0x88   :  { %110 = vst [vmem:[%s608_s2] sm:$0xff] %v102_v56  ;;  %111 = vst [vmem:[%s608_s2 + $0x8] sm:$0xff] %v103_v57  ;;  %v235_v59 = vrot.slane %v443_v58, 2  ;;  %vm250_vm9 = vcmp.ge.f32.partialorder %v443_v58, 0.0 }
  0x89   :  { %v281_v62 = vpop.permute.xlu1 %280  ;;  %vm249_vm10 = vcmp.ge.f32.partialorder %v211_v60, 0.0 }
  0x8a   :  { %v271_v63 = vpop.permute.xlu0 %270  ;;  %v243_v1 = vsel %vm101_vm0, %v211_v60, %v235_v59  ;;  %v283_v2 = vadd.f32 %v281_v62, %v437_v54 }
  0x8b   :  { %246 = vst [vmem:[%s608_s2 + $0x18] sm:$0xff] %v243_v1  ;;  %v273_v4 = vadd.f32 %v271_v63, %v267_v61 }
  0x8c   :  { %v297_v3 = vrot.slane %v283_v2, 2  ;;  %vm312_vm11 = vcmp.ge.f32.partialorder %v283_v2, 0.0 }
  0x8d   :  { %v163_v5 = vpop.permute.xlu1 %162  ;;  %vm311_vm12 = vcmp.ge.f32.partialorder %v273_v4, 0.0 }
  0x8e   :  { %v72_v6 = vpop.permute.xlu0 %71  ;;  %v305_v7 = vsel %vm101_vm0, %v273_v4, %v297_v3  ;;  %v461_v8 = vadd.f32 %v163_v5, %v143_v34  ;;  %vm508_vm0 = vmand %vm249_vm10, %vm250_vm9 }
  0x8f   :  { %v463_v9 = vadd.f32 %v72_v6, %v32_v35  ;;  %v465_v10 = vadd.f32 %v72_v6, %v36_v37  ;;  %308 = vst [vmem:[%s608_s2 + $0x20] sm:$0xff] %v305_v7  ;;  %vm516_vm3 = vmand %vm311_vm12, %vm312_vm11 }
  0x90   :  { %v176_v11 = vrot.slane %v461_v8, 4  ;;  %vm190_vm15 = vcmp.lt.f32.partialorder %v461_v8, 128.0 }
  0x91   :  { %v91_v12 = vrot.slane %v463_v9, 4  ;;  %v92_v13 = vrot.slane %v465_v10, 4  ;;  %v287_v15 = vpop.permute.xlu1 %286  ;;  %vm122_vm1 = vcmp.lt.f32.partialorder %v463_v9, 128.0  ;;  %vm123_vm4 = vcmp.lt.f32.partialorder %v465_v10, 128.0  ;;  %vm523_vm5 = vmand %vm474_vm8, %vm190_vm15 }
  0x92   :  { %v225_v16 = vpop.permute.xlu0 %224  ;;  %v182_v18 = vsel %vm104_vm2, %v173_v49, %v176_v11  ;;  %v487_v21 = vadd.f32 %v287_v15, %v267_v61  ;;  %vm533_vm6 = vmand %vm480_vm13, %vm122_vm1 }
  0x93   :  { %v105_v19 = vsel %vm104_vm2, %v85_v50, %v91_v12  ;;  %v106_v20 = vsel %vm104_vm2, %v86_v51, %v92_v13  ;;  %185 = vst [vmem:[%s608_s2 + $0x38] sm:$0xff] %v182_v18  ;;  %v227_v23 = vadd.f32 %v225_v16, %v205_v47  ;;  %vm543_vm8 = vmand %vm491_vm14, %vm123_vm4 }
  0x94   :  { %112 = vst [vmem:[%s608_s2 + $0x28] sm:$0xff] %v105_v19  ;;  %113 = vst [vmem:[%s608_s2 + $0x30] sm:$0xff] %v106_v20  ;;  %v300_v25 = vrot.slane %v487_v21, 4  ;;  %vm314_vm10 = vcmp.lt.f32.partialorder %v487_v21, 128.0 }
  0x95   :  { %v238_v27 = vrot.slane %v227_v23, 4  ;;  %v169_v28 = vpop.permute.xlu1 %168  ;;  %vm252_vm11 = vcmp.lt.f32.partialorder %v227_v23, 128.0  ;;  %vm315_vm1 = vmand %vm516_vm3, %vm314_vm10 }
  0x96   :  { %v79_v29 = vpop.permute.xlu0 %78  ;;  %v306_v34 = vsel %vm104_vm2, %v297_v3, %v300_v25  ;;  %v171_v35 = vadd.f32 %v169_v28, %v420_v31  ;;  %vm253_vm4 = vmand %vm508_vm0, %vm252_vm11 }
  0x97   :  { %v81_v36 = vadd.f32 %v79_v29, %v422_v32  ;;  %v82_v37 = vadd.f32 %v79_v29, %v424_v33  ;;  %309 = vst [vmem:[%s608_s2 + $0x48] sm:$0xff] %v306_v34  ;;  %v244_v39 = vsel %vm104_vm2, %v235_v59, %v238_v27 }
  0x98   :  { %247 = vst [vmem:[%s608_s2 + $0x40] sm:$0xff] %v244_v39  ;;  %v179_v32 = vrot.slane %v171_v35, 6  ;;  %vm192_vm9 = vcmp.lt.f32.partialorder %v171_v35, 128.0 }
  0x99   :  { %v97_v33 = vrot.slane %v81_v36, 6  ;;  %v98_v40 = vrot.slane %v82_v37, 6  ;;  %vm193_vm2 = vmand %vm523_vm5, %vm192_vm9  ;;  %vm126_vm12 = vcmp.lt.f32.partialorder %v81_v36, 128.0  ;;  %vm127_vm13 = vcmp.lt.f32.partialorder %v82_v37, 128.0  ;;  %v293_v41 = vpop.permute.xlu1 %292 }
  0x9a   :  { %v231_v42 = vpop.permute.xlu0 %230  ;;  %v183_v44 = vsel %vm107_vm7, %v176_v11, %v179_v32  ;;  %v194_v45 = vsel %vm193_vm2, 1, %v343_v0  ;;  %vm128_vm14 = vmand %vm533_vm6, %vm126_vm12  ;;  %v295_v49 = vadd.f32 %v293_v41, %v437_v54 }
  0x9b   :  { %v108_v46 = vsel %vm107_vm7, %v91_v12, %v97_v33  ;;  %v109_v47 = vsel %vm107_vm7, %v92_v13, %v98_v40  ;;  %186 = vst [vmem:[%s608_s2 + $0x60] sm:$0xff] %v183_v44  ;;  %195 = vst [vmem:[%s609_s3 + $0x10] sm:$0x3f] %v194_v45  ;;  %v130_v48 = vsel %vm128_vm14, 1, %v343_v0  ;;  %v233_v50 = vadd.f32 %v231_v42, %v432_v43 }
  0x9c   :  { %114 = vst [vmem:[%s608_s2 + $0x50] sm:$0xff] %v108_v46  ;;  %115 = vst [vmem:[%s608_s2 + $0x58] sm:$0xff] %v109_v47  ;;  %v303_v43 = vrot.slane %v295_v49, 6  ;;  %vm316_vm5 = vcmp.lt.f32.partialorder %v295_v49, 128.0 }
  0x9d   :  { %vm129_vm15 = vmand %vm543_vm8, %vm127_vm13  ;;  %132 = vst [vmem:[%s609_s3] sm:$0x3f] %v130_v48  ;;  %v241_v52 = vrot.slane %v233_v50, 6  ;;  %vm254_vm6 = vcmp.lt.f32.partialorder %v233_v50, 128.0 }
  0x9e   :  { %v131_v51 = vsel %vm129_vm15, 1, %v343_v0  ;;  %vm317_vm8 = vmand %vm315_vm1, %vm316_vm5  ;;  %v307_v53 = vsel %vm107_vm7, %v300_v25, %v303_v43 }
  0x9f   :  { %133 = vst [vmem:[%s609_s3 + $0x8] sm:$0x3f] %v131_v51  ;;  %v318_v54 = vsel %vm317_vm8, 1, %v343_v0  ;;  %v245_v55 = vsel %vm107_vm7, %v238_v27, %v241_v52  ;;  %vm255_vm3 = vmand %vm253_vm4, %vm254_vm6 }
  0xa0   :  { %310 = vst [vmem:[%s608_s2 + $0x70] sm:$0xff] %v307_v53  ;;  %319 = vst [vmem:[%s609_s3 + $0x20] sm:$0x3f] %v318_v54  ;;  %v256_v56 = vsel %vm255_vm3, 1, %v343_v0 }
  0xa1   :  { %248 = vst [vmem:[%s608_s2 + $0x68] sm:$0xff] %v245_v55  ;;  %257 = vst [vmem:[%s609_s3 + $0x18] sm:$0x3f] %v256_v56 }

</bundles_post_ra>
